<compile_context>
chip_gen: v5e
topology: v5e:2x2
jax: 0.10.0
libtpu: 0.0.40
codegen_flags: <defaults>
</compile_context>

<pallas_src>
import functools

import jax
import jax.numpy as jnp
from jax import lax
from jax.experimental import pallas as pl
from jax.experimental.pallas import tpu as pltpu

K = 3  # conv kernel size (opt=0 path)


# ----------------------------- Pallas kernel ------------------------------- #

def _fused_kernel(x_ref, w0_ref, w1_ref, w2_ref, o_ref, *, H, W, slope):
    """Fused conv0->act->conv1->act->conv2->act on a lane-packed slab.

    x_ref : (H, TL) f32, TL lanes = packed (batch, channel, image-column)
    w*_ref: (9, TL) f32, per-lane (i.e. per-channel) 3x3 taps, row t = ki*3+kj
    """
    x = x_ref[...]                                     # (H, TL)
    TL = x.shape[1]
    row = lax.broadcasted_iota(jnp.int32, (H, TL), 0)
    col = lax.broadcasted_iota(jnp.int32, (H, TL), 1) % W   # within-image col

    def shift_v(a, di):   # a[i, :] -> a[clamp(i + di, 0, H-1), :]
        if di == 0:
            return a
        if di < 0:
            return jnp.where(row == 0, a, pltpu.roll(a, 1, 0))
        return jnp.where(row == H - 1, a, pltpu.roll(a, H - 1, 0))

    def shift_h(a, dj):   # a[:, j] -> a[:, clamp(jj + dj) within the image]
        if dj == 0:
            return a
        if dj < 0:
            return jnp.where(col == 0, a, pltpu.roll(a, 1, 1))
        return jnp.where(col == W - 1, a, pltpu.roll(a, TL - 1, 1))

    def dwconv(a, w_ref):  # depthwise 3x3, replicate padding, VPU only
        w = w_ref[...]                                 # (9, TL)
        acc = jnp.zeros_like(a)
        t = 0
        for di in (-1, 0, 1):
            av = shift_v(a, di)
            for dj in (-1, 0, 1):
                acc = acc + shift_h(av, dj) * w[t:t + 1, :]
                t += 1
        return acc

    def lrelu(a):
        return jnp.where(a >= 0, a, slope * a)

    y = lrelu(dwconv(x, w0_ref))
    y = lrelu(dwconv(y, w1_ref))
    y = lrelu(dwconv(y, w2_ref))
    o_ref[...] = y


# ------------------------------ JAX wrapper --------------------------------- #

def _weights_to_lane_slab(w_oihw, B, W):
    """Depthwise weight (C, 1, K, K) -> (K*K, B*C*W) per-lane tap table."""
    C = w_oihw.shape[0]
    w = w_oihw.reshape(C, K * K).T.astype(jnp.float32)   # (9, C), row = ki*3+kj
    w = jnp.repeat(w, W, axis=1)                         # (9, C*W)
    w = jnp.tile(w, (1, B))                              # (9, B*C*W)
    return w


def _lane_tile(L, W):
    """Largest image-aligned lane tile; prefer multiples of 128 and >=2 tiles."""
    cands = [t for t in range(W, L + 1, W) if L % t == 0]
    dense = [t for t in cands if t % 128 == 0] or cands
    multi = [t for t in dense if L // t >= 2] or dense
    capped = [t for t in multi if t <= 2048] or multi
    return max(capped)


@functools.partial(jax.jit, static_argnames=("negative_slope",))
def simple_extractf_forward(x_nchw, w0, w1, w2, negative_slope=0.01):
    """SimpleExtractF forward.  x_nchw: (B, C, H, W); w*: (C, 1, K, K)."""
    B, C, H, W = x_nchw.shape
    L = B * C * W
    # Lane-packed slab: (H, B*C*W), lane order = (batch, channel, image col).
    x_slab = jnp.transpose(x_nchw.astype(jnp.float32), (2, 0, 1, 3)).reshape(H, L)
    w0s = _weights_to_lane_slab(w0, B, W)
    w1s = _weights_to_lane_slab(w1, B, W)
    w2s = _weights_to_lane_slab(w2, B, W)

    TL = _lane_tile(L, W)
    kern = functools.partial(_fused_kernel, H=H, W=W, slope=negative_slope)
    out_slab = pl.pallas_call(
        kern,
        out_shape=jax.ShapeDtypeStruct((H, L), jnp.float32),
        grid=(L // TL,),
        in_specs=[pl.BlockSpec((H, TL), lambda i: (0, i)),
                  pl.BlockSpec((K * K, TL), lambda i: (0, i)),
                  pl.BlockSpec((K * K, TL), lambda i: (0, i)),
                  pl.BlockSpec((K * K, TL), lambda i: (0, i))],
        out_specs=pl.BlockSpec((H, TL), lambda i: (0, i)),
        compiler_params=pltpu.CompilerParams(dimension_semantics=("parallel",)),
    )(x_slab, w0s, w1s, w2s)

    out = out_slab.reshape(H, B, C, W)
    return jnp.transpose(out, (1, 2, 0, 3))              # back to NCHW


# --------------------------- pure-JAX reference ------------------------------ #

def _dwconv_ref(x_nhwc, w_oihw):
    pad = (K - 1) // 2
    xp = jnp.pad(x_nhwc, ((0, 0), (pad, pad), (pad, pad), (0, 0)), mode="edge")
    w_hwio = jnp.transpose(w_oihw, (2, 3, 1, 0))          # (K, K, 1, C)
    return lax.conv_general_dilated(
        xp, w_hwio, window_strides=(1, 1), padding="VALID",
        dimension_numbers=("NHWC", "HWIO", "NHWC"),
        feature_group_count=x_nhwc.shape[-1])


def simple_extractf_reference(x_nchw, w0, w1, w2, negative_slope=0.01):
    x = jnp.transpose(x_nchw, (0, 2, 3, 1)).astype(jnp.float32)

    def lrelu(a):
        return jnp.where(a >= 0, a, negative_slope * a)

    y = lrelu(_dwconv_ref(x, w0))
    y = lrelu(_dwconv_ref(y, w1))
    y = lrelu(_dwconv_ref(y, w2))
    return jnp.transpose(y, (0, 3, 1, 2))


# --------------------------------- main -------------------------------------- #

if __name__ == "__main__":
    nscale = 4                 # channels (depthwise groups == channels)
    B, H, W_img = 2, 16, 16    # B*C*W = 128 lanes -> fully lane-dense slab

    key = jax.random.PRNGKey(0)
    kx, k0, k1, k2 = jax.random.split(key, 4)
    x = jax.random.normal(kx, (B, nscale, H, W_img), dtype=jnp.float32)   # NCHW
    # Depthwise Conv2d weights: (Cout, Cin/groups=1, K, K)
    w0 = jax.random.normal(k0, (nscale, 1, K, K), dtype=jnp.float32) * 0.3
    w1 = jax.random.normal(k1, (nscale, 1, K, K), dtype=jnp.float32) * 0.3
    w2 = jax.random.normal(k2, (nscale, 1, K, K), dtype=jnp.float32) * 0.3

    out = jax.block_until_ready(simple_extractf_forward(x, w0, w1, w2))
    ref = jax.block_until_ready(simple_extractf_reference(x, w0, w1, w2))

    assert out.shape == (B, nscale, H, W_img), out.shape
    assert jnp.allclose(out, ref, rtol=1e-3, atol=1e-3), (
        float(jnp.max(jnp.abs(out - ref))))

    print("KERNEL_OK")
</pallas_src>

<mosaic_0001>
module attributes {stable_mosaic.version = 11 : i64} {
  func.func @_fused_kernel(%arg0: i32, %arg1: memref<16x128xf32, #tpu.memory_space<vmem>>, %arg2: memref<9x128xf32, #tpu.memory_space<vmem>>, %arg3: memref<9x128xf32, #tpu.memory_space<vmem>>, %arg4: memref<9x128xf32, #tpu.memory_space<vmem>>, %arg5: memref<16x128xf32, #tpu.memory_space<vmem>>) attributes {dimension_semantics = [#tpu.dimension_semantics<parallel>], iteration_bounds = array<i64: 1>, scalar_prefetch = 0 : i64, scratch_operands = 0 : i64, tpu.core_type = #tpu.core_type<tc>, window_params = [{transform_indices = @transform_0, window_bounds = array<i64: 16, 128>}, {transform_indices = @transform_1, window_bounds = array<i64: 9, 128>}, {transform_indices = @transform_2, window_bounds = array<i64: 9, 128>}, {transform_indices = @transform_3, window_bounds = array<i64: 9, 128>}, {transform_indices = @transform_4, window_bounds = array<i64: 16, 128>}]} {
    %c0 = arith.constant 0 : index
    %c0_0 = arith.constant 0 : index
    %0 = vector.load %arg1[%c0, %c0_0] : memref<16x128xf32, #tpu.memory_space<vmem>>, vector<16x128xf32>
    %1 = tpu.iota {dimensions = array<i32: 0>} : vector<16x128xi32>
    %2 = tpu.iota {dimensions = array<i32: 1>} : vector<16x128xi32>
    %c16_i32 = arith.constant 16 : i32
    %c0_i32 = arith.constant 0 : i32
    %3 = arith.cmpi eq, %c16_i32, %c0_i32 : i32
    %c1_i32 = arith.constant 1 : i32
    %4 = arith.select %3, %c1_i32, %c16_i32 : i32
    %5 = vector.broadcast %4 : i32 to vector<16x128xi32>
    %6 = arith.remsi %2, %5 : vector<16x128xi32>
    %c0_i32_1 = arith.constant 0 : i32
    %7 = vector.broadcast %c0_i32_1 : i32 to vector<16x128xi32>
    %8 = arith.cmpi ne, %6, %7 : vector<16x128xi32>
    %c0_i32_2 = arith.constant 0 : i32
    %9 = vector.broadcast %c0_i32_2 : i32 to vector<16x128xi32>
    %10 = arith.cmpi slt, %6, %9 : vector<16x128xi32>
    %c0_i32_3 = arith.constant 0 : i32
    %11 = arith.cmpi slt, %4, %c0_i32_3 : i32
    %12 = vector.broadcast %11 : i1 to vector<16x128xi1>
    %13 = vector.broadcast %12 : vector<16x128xi1> to vector<16x128xi1>
    %14 = arith.xori %10, %13 : vector<16x128xi1>
    %15 = arith.andi %14, %8 : vector<16x128xi1>
    %16 = vector.broadcast %4 : i32 to vector<16x128xi32>
    %17 = arith.addi %6, %16 : vector<16x128xi32>
    %18 = arith.select %15, %17, %6 : vector<16x128xi1>, vector<16x128xi32>
    %c0_4 = arith.constant 0 : index
    %c0_5 = arith.constant 0 : index
    %19 = vector.load %arg2[%c0_4, %c0_5] : memref<9x128xf32, #tpu.memory_space<vmem>>, vector<9x128xf32>
    %cst = arith.constant 0.000000e+00 : f32
    %20 = vector.broadcast %cst : f32 to vector<16x128xf32>
    %c0_i32_6 = arith.constant 0 : i32
    %21 = vector.broadcast %c0_i32_6 : i32 to vector<16x128xi32>
    %22 = arith.cmpi eq, %1, %21 : vector<16x128xi32>
    %c1_i32_7 = arith.constant 1 : i32
    %23 = tpu.dynamic_rotate %0 by %c1_i32_7 dim 0 : vector<16x128xf32>, i32 -> vector<16x128xf32>
    %24 = arith.select %22, %0, %23 : vector<16x128xi1>, vector<16x128xf32>
    %c0_i32_8 = arith.constant 0 : i32
    %25 = vector.broadcast %c0_i32_8 : i32 to vector<16x128xi32>
    %26 = arith.cmpi eq, %18, %25 : vector<16x128xi32>
    %c1_i32_9 = arith.constant 1 : i32
    %27 = tpu.dynamic_rotate %24 by %c1_i32_9 dim 1 : vector<16x128xf32>, i32 -> vector<16x128xf32>
    %28 = arith.select %26, %24, %27 : vector<16x128xi1>, vector<16x128xf32>
    %29 = vector.extract_strided_slice %19 {offsets = [0, 0], sizes = [1, 128], strides = [1, 1]} : vector<9x128xf32> to vector<1x128xf32>
    %30 = vector.broadcast %29 : vector<1x128xf32> to vector<16x128xf32>
    %31 = arith.mulf %28, %30 : vector<16x128xf32>
    %32 = arith.addf %20, %31 : vector<16x128xf32>
    %33 = vector.extract_strided_slice %19 {offsets = [1, 0], sizes = [1, 128], strides = [1, 1]} : vector<9x128xf32> to vector<1x128xf32>
    %34 = vector.broadcast %33 : vector<1x128xf32> to vector<16x128xf32>
    %35 = arith.mulf %24, %34 : vector<16x128xf32>
    %36 = arith.addf %32, %35 : vector<16x128xf32>
    %c15_i32 = arith.constant 15 : i32
    %37 = vector.broadcast %c15_i32 : i32 to vector<16x128xi32>
    %38 = arith.cmpi eq, %18, %37 : vector<16x128xi32>
    %c127_i32 = arith.constant 127 : i32
    %39 = tpu.dynamic_rotate %24 by %c127_i32 dim 1 : vector<16x128xf32>, i32 -> vector<16x128xf32>
    %40 = arith.select %38, %24, %39 : vector<16x128xi1>, vector<16x128xf32>
    %41 = vector.extract_strided_slice %19 {offsets = [2, 0], sizes = [1, 128], strides = [1, 1]} : vector<9x128xf32> to vector<1x128xf32>
    %42 = vector.broadcast %41 : vector<1x128xf32> to vector<16x128xf32>
    %43 = arith.mulf %40, %42 : vector<16x128xf32>
    %44 = arith.addf %36, %43 : vector<16x128xf32>
    %c0_i32_10 = arith.constant 0 : i32
    %45 = vector.broadcast %c0_i32_10 : i32 to vector<16x128xi32>
    %46 = arith.cmpi eq, %18, %45 : vector<16x128xi32>
    %c1_i32_11 = arith.constant 1 : i32
    %47 = tpu.dynamic_rotate %0 by %c1_i32_11 dim 1 : vector<16x128xf32>, i32 -> vector<16x128xf32>
    %48 = arith.select %46, %0, %47 : vector<16x128xi1>, vector<16x128xf32>
    %49 = vector.extract_strided_slice %19 {offsets = [3, 0], sizes = [1, 128], strides = [1, 1]} : vector<9x128xf32> to vector<1x128xf32>
    %50 = vector.broadcast %49 : vector<1x128xf32> to vector<16x128xf32>
    %51 = arith.mulf %48, %50 : vector<16x128xf32>
    %52 = arith.addf %44, %51 : vector<16x128xf32>
    %53 = vector.extract_strided_slice %19 {offsets = [4, 0], sizes = [1, 128], strides = [1, 1]} : vector<9x128xf32> to vector<1x128xf32>
    %54 = vector.broadcast %53 : vector<1x128xf32> to vector<16x128xf32>
    %55 = arith.mulf %0, %54 : vector<16x128xf32>
    %56 = arith.addf %52, %55 : vector<16x128xf32>
    %c15_i32_12 = arith.constant 15 : i32
    %57 = vector.broadcast %c15_i32_12 : i32 to vector<16x128xi32>
    %58 = arith.cmpi eq, %18, %57 : vector<16x128xi32>
    %c127_i32_13 = arith.constant 127 : i32
    %59 = tpu.dynamic_rotate %0 by %c127_i32_13 dim 1 : vector<16x128xf32>, i32 -> vector<16x128xf32>
    %60 = arith.select %58, %0, %59 : vector<16x128xi1>, vector<16x128xf32>
    %61 = vector.extract_strided_slice %19 {offsets = [5, 0], sizes = [1, 128], strides = [1, 1]} : vector<9x128xf32> to vector<1x128xf32>
    %62 = vector.broadcast %61 : vector<1x128xf32> to vector<16x128xf32>
    %63 = arith.mulf %60, %62 : vector<16x128xf32>
    %64 = arith.addf %56, %63 : vector<16x128xf32>
    %c15_i32_14 = arith.constant 15 : i32
    %65 = vector.broadcast %c15_i32_14 : i32 to vector<16x128xi32>
    %66 = arith.cmpi eq, %1, %65 : vector<16x128xi32>
    %c15_i32_15 = arith.constant 15 : i32
    %67 = tpu.dynamic_rotate %0 by %c15_i32_15 dim 0 : vector<16x128xf32>, i32 -> vector<16x128xf32>
    %68 = arith.select %66, %0, %67 : vector<16x128xi1>, vector<16x128xf32>
    %c0_i32_16 = arith.constant 0 : i32
    %69 = vector.broadcast %c0_i32_16 : i32 to vector<16x128xi32>
    %70 = arith.cmpi eq, %18, %69 : vector<16x128xi32>
    %c1_i32_17 = arith.constant 1 : i32
    %71 = tpu.dynamic_rotate %68 by %c1_i32_17 dim 1 : vector<16x128xf32>, i32 -> vector<16x128xf32>
    %72 = arith.select %70, %68, %71 : vector<16x128xi1>, vector<16x128xf32>
    %73 = vector.extract_strided_slice %19 {offsets = [6, 0], sizes = [1, 128], strides = [1, 1]} : vector<9x128xf32> to vector<1x128xf32>
    %74 = vector.broadcast %73 : vector<1x128xf32> to vector<16x128xf32>
    %75 = arith.mulf %72, %74 : vector<16x128xf32>
    %76 = arith.addf %64, %75 : vector<16x128xf32>
    %77 = vector.extract_strided_slice %19 {offsets = [7, 0], sizes = [1, 128], strides = [1, 1]} : vector<9x128xf32> to vector<1x128xf32>
    %78 = vector.broadcast %77 : vector<1x128xf32> to vector<16x128xf32>
    %79 = arith.mulf %68, %78 : vector<16x128xf32>
    %80 = arith.addf %76, %79 : vector<16x128xf32>
    %c15_i32_18 = arith.constant 15 : i32
    %81 = vector.broadcast %c15_i32_18 : i32 to vector<16x128xi32>
    %82 = arith.cmpi eq, %18, %81 : vector<16x128xi32>
    %c127_i32_19 = arith.constant 127 : i32
    %83 = tpu.dynamic_rotate %68 by %c127_i32_19 dim 1 : vector<16x128xf32>, i32 -> vector<16x128xf32>
    %84 = arith.select %82, %68, %83 : vector<16x128xi1>, vector<16x128xf32>
    %85 = vector.extract_strided_slice %19 {offsets = [8, 0], sizes = [1, 128], strides = [1, 1]} : vector<9x128xf32> to vector<1x128xf32>
    %86 = vector.broadcast %85 : vector<1x128xf32> to vector<16x128xf32>
    %87 = arith.mulf %84, %86 : vector<16x128xf32>
    %88 = arith.addf %80, %87 : vector<16x128xf32>
    %cst_20 = arith.constant 0.000000e+00 : f32
    %89 = vector.broadcast %cst_20 : f32 to vector<16x128xf32>
    %90 = arith.cmpf oge, %88, %89 : vector<16x128xf32>
    %cst_21 = arith.constant 0.00999999977 : f32
    %91 = vector.broadcast %cst_21 : f32 to vector<16x128xf32>
    %92 = arith.mulf %91, %88 : vector<16x128xf32>
    %93 = arith.select %90, %88, %92 : vector<16x128xi1>, vector<16x128xf32>
    %c0_22 = arith.constant 0 : index
    %c0_23 = arith.constant 0 : index
    %94 = vector.load %arg3[%c0_22, %c0_23] : memref<9x128xf32, #tpu.memory_space<vmem>>, vector<9x128xf32>
    %cst_24 = arith.constant 0.000000e+00 : f32
    %95 = vector.broadcast %cst_24 : f32 to vector<16x128xf32>
    %c0_i32_25 = arith.constant 0 : i32
    %96 = vector.broadcast %c0_i32_25 : i32 to vector<16x128xi32>
    %97 = arith.cmpi eq, %1, %96 : vector<16x128xi32>
    %c1_i32_26 = arith.constant 1 : i32
    %98 = tpu.dynamic_rotate %93 by %c1_i32_26 dim 0 : vector<16x128xf32>, i32 -> vector<16x128xf32>
    %99 = arith.select %97, %93, %98 : vector<16x128xi1>, vector<16x128xf32>
    %c0_i32_27 = arith.constant 0 : i32
    %100 = vector.broadcast %c0_i32_27 : i32 to vector<16x128xi32>
    %101 = arith.cmpi eq, %18, %100 : vector<16x128xi32>
    %c1_i32_28 = arith.constant 1 : i32
    %102 = tpu.dynamic_rotate %99 by %c1_i32_28 dim 1 : vector<16x128xf32>, i32 -> vector<16x128xf32>
    %103 = arith.select %101, %99, %102 : vector<16x128xi1>, vector<16x128xf32>
    %104 = vector.extract_strided_slice %94 {offsets = [0, 0], sizes = [1, 128], strides = [1, 1]} : vector<9x128xf32> to vector<1x128xf32>
    %105 = vector.broadcast %104 : vector<1x128xf32> to vector<16x128xf32>
    %106 = arith.mulf %103, %105 : vector<16x128xf32>
    %107 = arith.addf %95, %106 : vector<16x128xf32>
    %108 = vector.extract_strided_slice %94 {offsets = [1, 0], sizes = [1, 128], strides = [1, 1]} : vector<9x128xf32> to vector<1x128xf32>
    %109 = vector.broadcast %108 : vector<1x128xf32> to vector<16x128xf32>
    %110 = arith.mulf %99, %109 : vector<16x128xf32>
    %111 = arith.addf %107, %110 : vector<16x128xf32>
    %c15_i32_29 = arith.constant 15 : i32
    %112 = vector.broadcast %c15_i32_29 : i32 to vector<16x128xi32>
    %113 = arith.cmpi eq, %18, %112 : vector<16x128xi32>
    %c127_i32_30 = arith.constant 127 : i32
    %114 = tpu.dynamic_rotate %99 by %c127_i32_30 dim 1 : vector<16x128xf32>, i32 -> vector<16x128xf32>
    %115 = arith.select %113, %99, %114 : vector<16x128xi1>, vector<16x128xf32>
    %116 = vector.extract_strided_slice %94 {offsets = [2, 0], sizes = [1, 128], strides = [1, 1]} : vector<9x128xf32> to vector<1x128xf32>
    %117 = vector.broadcast %116 : vector<1x128xf32> to vector<16x128xf32>
    %118 = arith.mulf %115, %117 : vector<16x128xf32>
    %119 = arith.addf %111, %118 : vector<16x128xf32>
    %c0_i32_31 = arith.constant 0 : i32
    %120 = vector.broadcast %c0_i32_31 : i32 to vector<16x128xi32>
    %121 = arith.cmpi eq, %18, %120 : vector<16x128xi32>
    %c1_i32_32 = arith.constant 1 : i32
    %122 = tpu.dynamic_rotate %93 by %c1_i32_32 dim 1 : vector<16x128xf32>, i32 -> vector<16x128xf32>
    %123 = arith.select %121, %93, %122 : vector<16x128xi1>, vector<16x128xf32>
    %124 = vector.extract_strided_slice %94 {offsets = [3, 0], sizes = [1, 128], strides = [1, 1]} : vector<9x128xf32> to vector<1x128xf32>
    %125 = vector.broadcast %124 : vector<1x128xf32> to vector<16x128xf32>
    %126 = arith.mulf %123, %125 : vector<16x128xf32>
    %127 = arith.addf %119, %126 : vector<16x128xf32>
    %128 = vector.extract_strided_slice %94 {offsets = [4, 0], sizes = [1, 128], strides = [1, 1]} : vector<9x128xf32> to vector<1x128xf32>
    %129 = vector.broadcast %128 : vector<1x128xf32> to vector<16x128xf32>
    %130 = arith.mulf %93, %129 : vector<16x128xf32>
    %131 = arith.addf %127, %130 : vector<16x128xf32>
    %c15_i32_33 = arith.constant 15 : i32
    %132 = vector.broadcast %c15_i32_33 : i32 to vector<16x128xi32>
    %133 = arith.cmpi eq, %18, %132 : vector<16x128xi32>
    %c127_i32_34 = arith.constant 127 : i32
    %134 = tpu.dynamic_rotate %93 by %c127_i32_34 dim 1 : vector<16x128xf32>, i32 -> vector<16x128xf32>
    %135 = arith.select %133, %93, %134 : vector<16x128xi1>, vector<16x128xf32>
    %136 = vector.extract_strided_slice %94 {offsets = [5, 0], sizes = [1, 128], strides = [1, 1]} : vector<9x128xf32> to vector<1x128xf32>
    %137 = vector.broadcast %136 : vector<1x128xf32> to vector<16x128xf32>
    %138 = arith.mulf %135, %137 : vector<16x128xf32>
    %139 = arith.addf %131, %138 : vector<16x128xf32>
    %c15_i32_35 = arith.constant 15 : i32
    %140 = vector.broadcast %c15_i32_35 : i32 to vector<16x128xi32>
    %141 = arith.cmpi eq, %1, %140 : vector<16x128xi32>
    %c15_i32_36 = arith.constant 15 : i32
    %142 = tpu.dynamic_rotate %93 by %c15_i32_36 dim 0 : vector<16x128xf32>, i32 -> vector<16x128xf32>
    %143 = arith.select %141, %93, %142 : vector<16x128xi1>, vector<16x128xf32>
    %c0_i32_37 = arith.constant 0 : i32
    %144 = vector.broadcast %c0_i32_37 : i32 to vector<16x128xi32>
    %145 = arith.cmpi eq, %18, %144 : vector<16x128xi32>
    %c1_i32_38 = arith.constant 1 : i32
    %146 = tpu.dynamic_rotate %143 by %c1_i32_38 dim 1 : vector<16x128xf32>, i32 -> vector<16x128xf32>
    %147 = arith.select %145, %143, %146 : vector<16x128xi1>, vector<16x128xf32>
    %148 = vector.extract_strided_slice %94 {offsets = [6, 0], sizes = [1, 128], strides = [1, 1]} : vector<9x128xf32> to vector<1x128xf32>
    %149 = vector.broadcast %148 : vector<1x128xf32> to vector<16x128xf32>
    %150 = arith.mulf %147, %149 : vector<16x128xf32>
    %151 = arith.addf %139, %150 : vector<16x128xf32>
    %152 = vector.extract_strided_slice %94 {offsets = [7, 0], sizes = [1, 128], strides = [1, 1]} : vector<9x128xf32> to vector<1x128xf32>
    %153 = vector.broadcast %152 : vector<1x128xf32> to vector<16x128xf32>
    %154 = arith.mulf %143, %153 : vector<16x128xf32>
    %155 = arith.addf %151, %154 : vector<16x128xf32>
    %c15_i32_39 = arith.constant 15 : i32
    %156 = vector.broadcast %c15_i32_39 : i32 to vector<16x128xi32>
    %157 = arith.cmpi eq, %18, %156 : vector<16x128xi32>
    %c127_i32_40 = arith.constant 127 : i32
    %158 = tpu.dynamic_rotate %143 by %c127_i32_40 dim 1 : vector<16x128xf32>, i32 -> vector<16x128xf32>
    %159 = arith.select %157, %143, %158 : vector<16x128xi1>, vector<16x128xf32>
    %160 = vector.extract_strided_slice %94 {offsets = [8, 0], sizes = [1, 128], strides = [1, 1]} : vector<9x128xf32> to vector<1x128xf32>
    %161 = vector.broadcast %160 : vector<1x128xf32> to vector<16x128xf32>
    %162 = arith.mulf %159, %161 : vector<16x128xf32>
    %163 = arith.addf %155, %162 : vector<16x128xf32>
    %cst_41 = arith.constant 0.000000e+00 : f32
    %164 = vector.broadcast %cst_41 : f32 to vector<16x128xf32>
    %165 = arith.cmpf oge, %163, %164 : vector<16x128xf32>
    %cst_42 = arith.constant 0.00999999977 : f32
    %166 = vector.broadcast %cst_42 : f32 to vector<16x128xf32>
    %167 = arith.mulf %166, %163 : vector<16x128xf32>
    %168 = arith.select %165, %163, %167 : vector<16x128xi1>, vector<16x128xf32>
    %c0_43 = arith.constant 0 : index
    %c0_44 = arith.constant 0 : index
    %169 = vector.load %arg4[%c0_43, %c0_44] : memref<9x128xf32, #tpu.memory_space<vmem>>, vector<9x128xf32>
    %cst_45 = arith.constant 0.000000e+00 : f32
    %170 = vector.broadcast %cst_45 : f32 to vector<16x128xf32>
    %c0_i32_46 = arith.constant 0 : i32
    %171 = vector.broadcast %c0_i32_46 : i32 to vector<16x128xi32>
    %172 = arith.cmpi eq, %1, %171 : vector<16x128xi32>
    %c1_i32_47 = arith.constant 1 : i32
    %173 = tpu.dynamic_rotate %168 by %c1_i32_47 dim 0 : vector<16x128xf32>, i32 -> vector<16x128xf32>
    %174 = arith.select %172, %168, %173 : vector<16x128xi1>, vector<16x128xf32>
    %c0_i32_48 = arith.constant 0 : i32
    %175 = vector.broadcast %c0_i32_48 : i32 to vector<16x128xi32>
    %176 = arith.cmpi eq, %18, %175 : vector<16x128xi32>
    %c1_i32_49 = arith.constant 1 : i32
    %177 = tpu.dynamic_rotate %174 by %c1_i32_49 dim 1 : vector<16x128xf32>, i32 -> vector<16x128xf32>
    %178 = arith.select %176, %174, %177 : vector<16x128xi1>, vector<16x128xf32>
    %179 = vector.extract_strided_slice %169 {offsets = [0, 0], sizes = [1, 128], strides = [1, 1]} : vector<9x128xf32> to vector<1x128xf32>
    %180 = vector.broadcast %179 : vector<1x128xf32> to vector<16x128xf32>
    %181 = arith.mulf %178, %180 : vector<16x128xf32>
    %182 = arith.addf %170, %181 : vector<16x128xf32>
    %183 = vector.extract_strided_slice %169 {offsets = [1, 0], sizes = [1, 128], strides = [1, 1]} : vector<9x128xf32> to vector<1x128xf32>
    %184 = vector.broadcast %183 : vector<1x128xf32> to vector<16x128xf32>
    %185 = arith.mulf %174, %184 : vector<16x128xf32>
    %186 = arith.addf %182, %185 : vector<16x128xf32>
    %c15_i32_50 = arith.constant 15 : i32
    %187 = vector.broadcast %c15_i32_50 : i32 to vector<16x128xi32>
    %188 = arith.cmpi eq, %18, %187 : vector<16x128xi32>
    %c127_i32_51 = arith.constant 127 : i32
    %189 = tpu.dynamic_rotate %174 by %c127_i32_51 dim 1 : vector<16x128xf32>, i32 -> vector<16x128xf32>
    %190 = arith.select %188, %174, %189 : vector<16x128xi1>, vector<16x128xf32>
    %191 = vector.extract_strided_slice %169 {offsets = [2, 0], sizes = [1, 128], strides = [1, 1]} : vector<9x128xf32> to vector<1x128xf32>
    %192 = vector.broadcast %191 : vector<1x128xf32> to vector<16x128xf32>
    %193 = arith.mulf %190, %192 : vector<16x128xf32>
    %194 = arith.addf %186, %193 : vector<16x128xf32>
    %c0_i32_52 = arith.constant 0 : i32
    %195 = vector.broadcast %c0_i32_52 : i32 to vector<16x128xi32>
    %196 = arith.cmpi eq, %18, %195 : vector<16x128xi32>
    %c1_i32_53 = arith.constant 1 : i32
    %197 = tpu.dynamic_rotate %168 by %c1_i32_53 dim 1 : vector<16x128xf32>, i32 -> vector<16x128xf32>
    %198 = arith.select %196, %168, %197 : vector<16x128xi1>, vector<16x128xf32>
    %199 = vector.extract_strided_slice %169 {offsets = [3, 0], sizes = [1, 128], strides = [1, 1]} : vector<9x128xf32> to vector<1x128xf32>
    %200 = vector.broadcast %199 : vector<1x128xf32> to vector<16x128xf32>
    %201 = arith.mulf %198, %200 : vector<16x128xf32>
    %202 = arith.addf %194, %201 : vector<16x128xf32>
    %203 = vector.extract_strided_slice %169 {offsets = [4, 0], sizes = [1, 128], strides = [1, 1]} : vector<9x128xf32> to vector<1x128xf32>
    %204 = vector.broadcast %203 : vector<1x128xf32> to vector<16x128xf32>
    %205 = arith.mulf %168, %204 : vector<16x128xf32>
    %206 = arith.addf %202, %205 : vector<16x128xf32>
    %c15_i32_54 = arith.constant 15 : i32
    %207 = vector.broadcast %c15_i32_54 : i32 to vector<16x128xi32>
    %208 = arith.cmpi eq, %18, %207 : vector<16x128xi32>
    %c127_i32_55 = arith.constant 127 : i32
    %209 = tpu.dynamic_rotate %168 by %c127_i32_55 dim 1 : vector<16x128xf32>, i32 -> vector<16x128xf32>
    %210 = arith.select %208, %168, %209 : vector<16x128xi1>, vector<16x128xf32>
    %211 = vector.extract_strided_slice %169 {offsets = [5, 0], sizes = [1, 128], strides = [1, 1]} : vector<9x128xf32> to vector<1x128xf32>
    %212 = vector.broadcast %211 : vector<1x128xf32> to vector<16x128xf32>
    %213 = arith.mulf %210, %212 : vector<16x128xf32>
    %214 = arith.addf %206, %213 : vector<16x128xf32>
    %c15_i32_56 = arith.constant 15 : i32
    %215 = vector.broadcast %c15_i32_56 : i32 to vector<16x128xi32>
    %216 = arith.cmpi eq, %1, %215 : vector<16x128xi32>
    %c15_i32_57 = arith.constant 15 : i32
    %217 = tpu.dynamic_rotate %168 by %c15_i32_57 dim 0 : vector<16x128xf32>, i32 -> vector<16x128xf32>
    %218 = arith.select %216, %168, %217 : vector<16x128xi1>, vector<16x128xf32>
    %c0_i32_58 = arith.constant 0 : i32
    %219 = vector.broadcast %c0_i32_58 : i32 to vector<16x128xi32>
    %220 = arith.cmpi eq, %18, %219 : vector<16x128xi32>
    %c1_i32_59 = arith.constant 1 : i32
    %221 = tpu.dynamic_rotate %218 by %c1_i32_59 dim 1 : vector<16x128xf32>, i32 -> vector<16x128xf32>
    %222 = arith.select %220, %218, %221 : vector<16x128xi1>, vector<16x128xf32>
    %223 = vector.extract_strided_slice %169 {offsets = [6, 0], sizes = [1, 128], strides = [1, 1]} : vector<9x128xf32> to vector<1x128xf32>
    %224 = vector.broadcast %223 : vector<1x128xf32> to vector<16x128xf32>
    %225 = arith.mulf %222, %224 : vector<16x128xf32>
    %226 = arith.addf %214, %225 : vector<16x128xf32>
    %227 = vector.extract_strided_slice %169 {offsets = [7, 0], sizes = [1, 128], strides = [1, 1]} : vector<9x128xf32> to vector<1x128xf32>
    %228 = vector.broadcast %227 : vector<1x128xf32> to vector<16x128xf32>
    %229 = arith.mulf %218, %228 : vector<16x128xf32>
    %230 = arith.addf %226, %229 : vector<16x128xf32>
    %c15_i32_60 = arith.constant 15 : i32
    %231 = vector.broadcast %c15_i32_60 : i32 to vector<16x128xi32>
    %232 = arith.cmpi eq, %18, %231 : vector<16x128xi32>
    %c127_i32_61 = arith.constant 127 : i32
    %233 = tpu.dynamic_rotate %218 by %c127_i32_61 dim 1 : vector<16x128xf32>, i32 -> vector<16x128xf32>
    %234 = arith.select %232, %218, %233 : vector<16x128xi1>, vector<16x128xf32>
    %235 = vector.extract_strided_slice %169 {offsets = [8, 0], sizes = [1, 128], strides = [1, 1]} : vector<9x128xf32> to vector<1x128xf32>
    %236 = vector.broadcast %235 : vector<1x128xf32> to vector<16x128xf32>
    %237 = arith.mulf %234, %236 : vector<16x128xf32>
    %238 = arith.addf %230, %237 : vector<16x128xf32>
    %cst_62 = arith.constant 0.000000e+00 : f32
    %239 = vector.broadcast %cst_62 : f32 to vector<16x128xf32>
    %240 = arith.cmpf oge, %238, %239 : vector<16x128xf32>
    %cst_63 = arith.constant 0.00999999977 : f32
    %241 = vector.broadcast %cst_63 : f32 to vector<16x128xf32>
    %242 = arith.mulf %241, %238 : vector<16x128xf32>
    %243 = arith.select %240, %238, %242 : vector<16x128xi1>, vector<16x128xf32>
    %c0_64 = arith.constant 0 : index
    %c0_65 = arith.constant 0 : index
    %244 = vector.load %arg5[%c0_64, %c0_65] : memref<16x128xf32, #tpu.memory_space<vmem>>, vector<16x128xf32>
    tpu.vector_store %arg5[%c0_64, %c0_65], %243 {strides = array<i32>} : memref<16x128xf32, #tpu.memory_space<vmem>>, vector<16x128xf32>,
    return
  }
  func.func @transform_0(%arg0: i32) -> (i32, i32) {
    %c0_i32 = arith.constant 0 : i32
    %c0_i32_0 = arith.constant 0 : i32
    return %c0_i32, %arg0 : i32, i32
  }
  func.func @transform_1(%arg0: i32) -> (i32, i32) {
    %c0_i32 = arith.constant 0 : i32
    %c0_i32_0 = arith.constant 0 : i32
    return %c0_i32, %arg0 : i32, i32
  }
  func.func @transform_2(%arg0: i32) -> (i32, i32) {
    %c0_i32 = arith.constant 0 : i32
    %c0_i32_0 = arith.constant 0 : i32
    return %c0_i32, %arg0 : i32, i32
  }
  func.func @transform_3(%arg0: i32) -> (i32, i32) {
    %c0_i32 = arith.constant 0 : i32
    %c0_i32_0 = arith.constant 0 : i32
    return %c0_i32, %arg0 : i32, i32
  }
  func.func @transform_4(%arg0: i32) -> (i32, i32) {
    %c0_i32 = arith.constant 0 : i32
    %c0_i32_0 = arith.constant 0 : i32
    return %c0_i32, %arg0 : i32, i32
  }
}

</mosaic_0001>

<bundles_post_ra>
// kernel: tile.23
= control target key start
LH: loop header
LB: loop body
LE: loop exit
PB: predicated region body
PF: predicated region fallthrough
CT: control target
= control target key end

     0   :  { %vm40_vm0 = vcmask 1047556   ;;  %vm42_vm1 = vcmask 523264   ;;  %vm57_vm2 = vcmask 1048064   ;;  %s127_s0 = inlined_call_operand.vmem [shape: f32[9,2,64], index: 0, kind: input, shape index: {}]   ;;  %s128_s1 = inlined_call_operand.vmem [shape: f32[9,128], index: 1, kind: output, shape index: {}]  }
   0x1   :  { %v67_v0 = vld [vmem:[%s127_s0 + $0xe] sm:$0x3]  ;;  %v68_v1 = vld [vmem:[%s127_s0 + $0xc] sm:$0x3]  ;;  %v69_v2 = vld [vmem:[%s127_s0 + $0xa] sm:$0x3] }
   0x2   :  { %11 = vst [vmem:[#allocation0 + $0x38] sm:$0x3] %v67_v0  ;;  %v70_v3 = vld [vmem:[%s127_s0 + $0x8] sm:$0x3]  ;;  %v71_v4 = vld [vmem:[%s127_s0 + $0x6] sm:$0x3] }
   0x3   :  { %15 = vst [vmem:[#allocation0 + $0x30] sm:$0x3] %v68_v1  ;;  %v72_v5 = vld [vmem:[%s127_s0 + $0x4] sm:$0x3]  ;;  %v73_v6 = vld [vmem:[%s127_s0 + $0x2] sm:$0x3] }
   0x4   :  { %19 = vst [vmem:[#allocation0 + $0x28] sm:$0x3] %v69_v2  ;;  %v36_v7 = vld [vmem:[%s127_s0] sm:$0x3]  ;;  %v66_v8 = vld [vmem:[%s127_s0 + $0x10] sm:$0x3] }
   0x5   :  { %23 = vst [vmem:[#allocation0 + $0x20] sm:$0x3] %v70_v3  ;;  %s77_s0 = smov 64  }
   0x6   :  { %27 = vst [vmem:[#allocation0 + $0x18] sm:$0x3] %v71_v4 }
   0x7   :  { %31 = vst [vmem:[#allocation0 + $0x10] sm:$0x3] %v72_v5 }
   0x8   :  { %35 = vst [vmem:[#allocation0 + $0x8] sm:$0x3] %v73_v6 }
   0x9   :  { %37 = vst [vmem:[#allocation0] sm:$0x3] %v36_v7 }
   0xa   :  { %7 = vst [vmem:[#allocation0 + $0x40] sm:$0x3] %v66_v8 }
   0xc   :  { %v52_v9 = vld [vmem:[#allocation0 + $0x1] ss:$8 sm:$0xf0]   ;;  %v39_v10 = vld [vmem:[#allocation0] ss:$8 sm:$0xf0]  }
  0x10   :  { %v38_v11 = vld [vmem:[#allocation0] ss:$8 sm:$0xf]   ;;  %v50_v12 = vld [vmem:[#allocation0 + $0x1] ss:$8 sm:$0xf]  }
  0x11   :  { %v54_v13 = vsel %vm40_vm0, %v52_v9, %v50_v12  ;;  %v41_v14 = vsel %vm40_vm0, %v39_v10, %v38_v11  ;;  %v60_v15 = vld [vmem:[#allocation0 + $0x41] sm:$0x1]   ;;  %v45_v16 = vld [vmem:[#allocation0 + $0x40] sm:$0x1]  }
  0x12   :  { %55 = vrot.lane.b32.xlu0 %v54_v13, %s77_s0  ;;  %43 = vst.msk [vmem:[%s128_s1] sm:$0xff] %vm42_vm1, %v41_v14  }
  0x13   :  { %74 = vst.msk [vmem:[%s128_s1 + $0x8] sm:$0x1] %vm42_vm1, %v45_v16  }
  0x1a   :  { %61 = vrot.lane.b32.xlu0 %v60_v15, %s77_s0 }
  0x84   :  { %v56_v17 = vpop.permute.xlu0 %55  }
  0x85   :  { %58 = vst.msk [vmem:[%s128_s1] sm:$0xff] %vm57_vm2, %v56_v17  }
  0x8c   :  { %v62_v18 = vpop.permute.xlu0 %61  }
  0x8d   :  { %75 = vst.msk [vmem:[%s128_s1 + $0x8] sm:$0x1] %vm57_vm2, %v62_v18  }

// kernel: simple_extractf_forward.1
= control target key start
LH: loop header
LB: loop body
LE: loop exit
PB: predicated region body
PF: predicated region fallthrough
CT: control target
= control target key end

     0   :  { %v19_v0 = vlaneseq  ;;  %s358_s19 = smov 1   ;;  %s708_s0 = inlined_call_operand.vmem [shape: f32[16,128], index: 0, kind: input, shape index: {}]   ;;  %s709_s1 = inlined_call_operand.vmem [shape: f32[9,128], index: 1, kind: input, shape index: {}]   ;;  %s710_s2 = inlined_call_operand.vmem [shape: f32[9,128], index: 2, kind: input, shape index: {}]   ;;  %s711_s3 = inlined_call_operand.vmem [shape: f32[9,128], index: 3, kind: input, shape index: {}]   ;;  %s712_s4 = inlined_call_operand.vmem [shape: f32[16,128], index: 4, kind: output, shape index: {}]  }
   0x1   :  { %v388_v1 = vld [vmem:[%s708_s0] sm:$0xff]  ;;  %v393_v2 = vld [vmem:[%s708_s0 + $0x8] sm:$0xff]  ;;  %s359_s0 = smov 127  }
   0x2   :  { %v395_v3 = vshrl.u32 %v19_v0, 7  ;;  %v40_v4 = vrot.slane %v388_v1, 7  ;;  %v41_v5 = vrot.slane %v393_v2, 7  ;;  %76 = vrot.lane.b32.xlu2 %v388_v1, %s358_s19  ;;  %v105_v9 = vrot.slane %v388_v1, 1  ;;  %v449_v18 = vld [vmem:[%s709_s1] sm:$0xff] }
   0x3   :  { %v106_v10 = vrot.slane %v393_v2, 1  ;;  %v23_v15 = vand.u32 127, %v19_v0  ;;  %v54_v20 = vperm.slane %v449_v18, 0  ;;  %v59_v21 = vperm.slane %v449_v18, 1 }
   0x4   :  { %vm38_vm0 = vcmp.eq.s32.totalorder %v395_v3, 0  ;;  %vm42_vm1 = vcmp.lt.s32.totalorder %v395_v3, 1  ;;  %vm107_vm2 = vcmp.lt.s32.totalorder %v395_v3, 7  ;;  %v424_v12 = vadd.s32 8, %v395_v3  ;;  %v653_v3 = vld [vmem:[%s711_s3] sm:$0xff] }
   0x5   :  { %v44_v6 = vsel %vm42_vm1, %v41_v5, %v40_v4  ;;  %v43_v8 = vsel %vm42_vm1, %v40_v4, %v41_v5  ;;  %v421_v11 = vsel %vm107_vm2, %v105_v9, %v106_v10  ;;  %v109_v13 = vsel %vm107_vm2, %v106_v10, %v105_v9 }
   0x6   :  { %v45_v7 = vsel %vm38_vm0, %v388_v1, %v44_v6  ;;  %vm104_vm3 = vcmp.eq.s32.totalorder %v424_v12, 15  ;;  %v28_v17 = vand.u32 15, %v23_v15  ;;  %v71_v26 = vperm.slane %v449_v18, 2 }
   0x7   :  { %65 = vrot.lane.b32.xlu1 %v45_v7, %s359_s0  ;;  %48 = vrot.lane.b32.xlu0 %v45_v7, %s358_s19  ;;  %v438_v14 = vsel %vm104_vm3, %v393_v2, %v109_v13  ;;  %v60_v28 = vmul.f32 %v59_v21, %v45_v7  ;;  %v82_v31 = vperm.slane %v449_v18, 3  ;;  %v61_v37 = vmul.f32 %v59_v21, %v43_v8 }
   0x8   :  { %vm451_vm4 = vcmp.eq.s32.totalorder %v28_v17, 0  ;;  %vm457_vm5 = vcmp.eq.s32.totalorder %v28_v17, 15  ;;  %v87_v41 = vperm.slane %v449_v18, 4  ;;  %v98_v52 = vperm.slane %v449_v18, 5 }
   0x9   :  { %v118_v53 = vperm.slane %v449_v18, 6  ;;  %v123_v59 = vperm.slane %v449_v18, 7 }
   0xa   :  { %78 = vrot.lane.b32.xlu2 %v393_v2, %s358_s19  ;;  %v88_v49 = vmul.f32 %v87_v41, %v388_v1  ;;  %v89_v57 = vmul.f32 %v87_v41, %v393_v2 }
   0xf   :  { %67 = vrot.lane.b32.xlu1 %v43_v8, %s359_s0  ;;  %50 = vrot.lane.b32.xlu0 %v43_v8, %s358_s19 }
  0x12   :  { %112 = vrot.lane.b32.xlu2 %v421_v11, %s358_s19 }
  0x17   :  { %94 = vrot.lane.b32.xlu1 %v393_v2, %s359_s0  ;;  %92 = vrot.lane.b32.xlu0 %v388_v1, %s359_s0 }
  0x1a   :  { %130 = vrot.lane.b32.xlu2 %v438_v14, %s359_s0 }
  0x1f   :  { %128 = vrot.lane.b32.xlu1 %v421_v11, %s359_s0  ;;  %114 = vrot.lane.b32.xlu0 %v438_v14, %s358_s19 }
  0x5c   :  { %v77_v16 = vpop.permute.xlu2 %76 }
  0x5d   :  { %v80_v34 = vsel %vm451_vm4, %v388_v1, %v77_v16  ;;  %v125_v16 = vmul.f32 %v123_v59, %v438_v14 }
  0x5e   :  { %v83_v38 = vmul.f32 %v82_v31, %v80_v34 }
  0x64   :  { %v79_v29 = vpop.permute.xlu2 %78 }
  0x65   :  { %v81_v45 = vsel %vm451_vm4, %v393_v2, %v79_v29 }
  0x66   :  { %v84_v48 = vmul.f32 %v82_v31, %v81_v45 }
  0x6c   :  { %v113_v47 = vpop.permute.xlu2 %112 }
  0x6d   :  { %v116_v54 = vsel %vm451_vm4, %v421_v11, %v113_v47 }
  0x6e   :  { %v119_v63 = vmul.f32 %v118_v53, %v116_v54 }
  0x74   :  { %v131_v9 = vpop.permute.xlu2 %130 }
  0x75   :  { %v133_v17 = vsel %vm457_vm5, %v438_v14, %v131_v9 }
  0x79   :  { %v66_v23 = vpop.permute.xlu1 %65  ;;  %v49_v24 = vpop.permute.xlu0 %48 }
  0x7a   :  { %v52_v25 = vsel %vm451_vm4, %v45_v7, %v49_v24  ;;  %v69_v30 = vsel %vm457_vm5, %v45_v7, %v66_v23 }
  0x7b   :  { %v55_v27 = vmul.f32 %v54_v20, %v52_v25  ;;  %v72_v32 = vmul.f32 %v71_v26, %v69_v30 }
  0x7d   :  { %v62_v33 = vadd.f32 %v60_v28, %v55_v27 }
  0x7f   :  { %v74_v42 = vadd.f32 %v72_v32, %v62_v33 }
  0x81   :  { %v68_v35 = vpop.permute.xlu1 %67  ;;  %v51_v36 = vpop.permute.xlu0 %50  ;;  %v85_v50 = vadd.f32 %v83_v38, %v74_v42 }
  0x82   :  { %v70_v39 = vsel %vm457_vm5, %v43_v8, %v68_v35  ;;  %v53_v40 = vsel %vm451_vm4, %v43_v8, %v51_v36  ;;  %v124_v8 = vmul.f32 %v123_v59, %v421_v11 }
  0x83   :  { %v73_v43 = vmul.f32 %v71_v26, %v70_v39  ;;  %v56_v44 = vmul.f32 %v54_v20, %v53_v40  ;;  %v90_v61 = vadd.f32 %v88_v49, %v85_v50 }
  0x85   :  { %v63_v46 = vadd.f32 %v61_v37, %v56_v44  ;;  %v555_v44 = vld [vmem:[%s710_s2] sm:$0xff] }
  0x86   :  { %v164_v49 = vperm.slane %v555_v44, 1 }
  0x87   :  { %v75_v51 = vadd.f32 %v73_v43, %v63_v46  ;;  %v159_v46 = vperm.slane %v555_v44, 0 }
  0x89   :  { %v95_v55 = vpop.permute.xlu1 %94  ;;  %v93_v56 = vpop.permute.xlu0 %92  ;;  %v86_v60 = vadd.f32 %v84_v48, %v75_v51  ;;  %v175_v51 = vperm.slane %v555_v44, 2 }
  0x8a   :  { %v96_v58 = vsel %vm457_vm5, %v388_v1, %v93_v56  ;;  %v97_v0 = vsel %vm457_vm5, %v393_v2, %v95_v55  ;;  %v355_v1 = vld [vmem:[%s709_s1 + $0x8] ss:$0 sm:$0xff] }
  0x8b   :  { %v99_v62 = vmul.f32 %v98_v52, %v96_v58  ;;  %v91_v5 = vadd.f32 %v89_v57, %v86_v60  ;;  %v100_v6 = vmul.f32 %v98_v52, %v97_v0  ;;  %v136_v26 = vmul.f32 %v355_v1, %v133_v17 }
  0x8d   :  { %v101_v4 = vadd.f32 %v99_v62, %v90_v61  ;;  %v102_v18 = vadd.f32 %v100_v6, %v91_v5  ;;  %v191_v62 = vperm.slane %v555_v44, 4 }
  0x8f   :  { %v121_v7 = vadd.f32 %v119_v63, %v101_v4  ;;  %v186_v63 = vperm.slane %v555_v44, 3 }
  0x91   :  { %v129_v10 = vpop.permute.xlu1 %128  ;;  %v115_v13 = vpop.permute.xlu0 %114  ;;  %v126_v20 = vadd.f32 %v124_v8, %v121_v7 }
  0x92   :  { %v132_v15 = vsel %vm457_vm5, %v421_v11, %v129_v10  ;;  %v117_v2 = vsel %vm451_vm4, %v438_v14, %v115_v13 }
  0x93   :  { %v135_v21 = vmul.f32 %v355_v1, %v132_v15  ;;  %v120_v23 = vmul.f32 %v118_v53, %v117_v2  ;;  %v219_v15 = vperm.slane %v555_v44, 6  ;;  %v202_v2 = vperm.slane %v555_v44, 5 }
  0x95   :  { %v137_v24 = vadd.f32 %v135_v21, %v126_v20  ;;  %v122_v25 = vadd.f32 %v120_v23, %v102_v18 }
  0x97   :  { %vm139_vm6 = vcmp.ge.f32.partialorder %v137_v24, 0.0  ;;  %v141_v27 = vmul.f32 0.01, %v137_v24  ;;  %v127_v11 = vadd.f32 %v125_v16, %v122_v25  ;;  %v224_v25 = vperm.slane %v555_v44, 7 }
  0x99   :  { %v506_v28 = vsel %vm139_vm6, %v137_v24, %v141_v27  ;;  %v138_v29 = vadd.f32 %v136_v26, %v127_v11 }
  0x9a   :  { %180 = vrot.lane.b32.xlu1 %v506_v28, %s358_s19  ;;  %v147_v14 = vrot.slane %v506_v28, 7  ;;  %v207_v37 = vrot.slane %v506_v28, 1  ;;  %v192_v10 = vmul.f32 %v191_v62, %v506_v28 }
  0x9b   :  { %vm140_vm7 = vcmp.ge.f32.partialorder %v138_v29, 0.0  ;;  %v142_v30 = vmul.f32 0.01, %v138_v29 }
  0x9d   :  { %v510_v31 = vsel %vm140_vm7, %v138_v29, %v142_v30 }
  0x9e   :  { %182 = vrot.lane.b32.xlu2 %v510_v31, %s358_s19  ;;  %v148_v32 = vrot.slane %v510_v31, 7  ;;  %v208_v36 = vrot.slane %v510_v31, 1  ;;  %v193_v29 = vmul.f32 %v191_v62, %v510_v31 }
  0xa0   :  { %v149_v33 = vsel %vm42_vm1, %v147_v14, %v148_v32  ;;  %v150_v34 = vsel %vm42_vm1, %v148_v32, %v147_v14  ;;  %v533_v38 = vsel %vm107_vm2, %v207_v37, %v208_v36  ;;  %v210_v39 = vsel %vm107_vm2, %v208_v36, %v207_v37 }
  0xa1   :  { %171 = vrot.lane.b32.xlu0 %v149_v33, %s359_s0  ;;  %v151_v35 = vsel %vm38_vm0, %v506_v28, %v150_v34  ;;  %v546_v40 = vsel %vm104_vm3, %v510_v31, %v210_v39  ;;  %v166_v52 = vmul.f32 %v164_v49, %v149_v33 }
  0xa2   :  { %155 = vrot.lane.b32.xlu1 %v149_v33, %s358_s19  ;;  %v165_v59 = vmul.f32 %v164_v49, %v151_v35 }
  0xa6   :  { %169 = vrot.lane.b32.xlu2 %v151_v35, %s359_s0 }
  0xa9   :  { %153 = vrot.lane.b32.xlu0 %v151_v35, %s358_s19 }
  0xaa   :  { %198 = vrot.lane.b32.xlu1 %v510_v31, %s359_s0 }
  0xae   :  { %213 = vrot.lane.b32.xlu2 %v533_v38, %s358_s19 }
  0xb1   :  { %196 = vrot.lane.b32.xlu0 %v506_v28, %s359_s0 }
  0xb2   :  { %229 = vrot.lane.b32.xlu1 %v533_v38, %s359_s0 }
  0xb6   :  { %231 = vrot.lane.b32.xlu2 %v546_v40, %s359_s0 }
  0xb9   :  { %215 = vrot.lane.b32.xlu0 %v546_v40, %s358_s19 }
  0xf8   :  { %v183_v42 = vpop.permute.xlu2 %182 }
  0xf9   :  { %v185_v6 = vsel %vm451_vm4, %v510_v31, %v183_v42 }
  0xfa   :  { %v188_v13 = vmul.f32 %v186_v63, %v185_v6  ;;  %v260_v6 = vperm.slane %v653_v3, 0 }
 0x100   :  { %v170_v48 = vpop.permute.xlu2 %169 }
 0x101   :  { %v173_v54 = vsel %vm457_vm5, %v151_v35, %v170_v48 }
 0x102   :  { %v176_v0 = vmul.f32 %v175_v51, %v173_v54 }
 0x108   :  { %v214_v7 = vpop.permute.xlu2 %213 }
 0x109   :  { %v217_v18 = vsel %vm451_vm4, %v533_v38, %v214_v7 }
 0x10a   :  { %v220_v11 = vmul.f32 %v219_v15, %v217_v18 }
 0x10c   :  { %v181_v41 = vpop.permute.xlu1 %180 }
 0x10d   :  { %v184_v61 = vsel %vm451_vm4, %v506_v28, %v181_v41 }
 0x10e   :  { %v187_v8 = vmul.f32 %v186_v63, %v184_v61 }
 0x110   :  { %v232_v36 = vpop.permute.xlu2 %231 }
 0x113   :  { %v172_v43 = vpop.permute.xlu0 %171 }
 0x114   :  { %v156_v45 = vpop.permute.xlu1 %155  ;;  %v174_v55 = vsel %vm457_vm5, %v149_v33, %v172_v43 }
 0x115   :  { %v158_v47 = vsel %vm451_vm4, %v149_v33, %v156_v45  ;;  %v177_v4 = vmul.f32 %v175_v51, %v174_v55  ;;  %v234_v45 = vsel %vm457_vm5, %v546_v40, %v232_v36  ;;  %v303_v36 = vperm.slane %v653_v3, 5 }
 0x116   :  { %v161_v50 = vmul.f32 %v159_v46, %v158_v47  ;;  %v226_v47 = vmul.f32 %v224_v25, %v546_v40 }
 0x118   :  { %v168_v58 = vadd.f32 %v166_v52, %v161_v50 }
 0x11a   :  { %v179_v1 = vadd.f32 %v177_v4, %v168_v58 }
 0x11b   :  { %v154_v53 = vpop.permute.xlu0 %153 }
 0x11c   :  { %v157_v56 = vsel %vm451_vm4, %v151_v35, %v154_v53  ;;  %v199_v57 = vpop.permute.xlu1 %198  ;;  %v190_v21 = vadd.f32 %v188_v13, %v179_v1  ;;  %v225_v35 = vmul.f32 %v224_v25, %v533_v38  ;;  %v287_v25 = vperm.slane %v653_v3, 3 }
 0x11d   :  { %v160_v60 = vmul.f32 %v159_v46, %v157_v56  ;;  %v201_v27 = vsel %vm457_vm5, %v510_v31, %v199_v57 }
 0x11e   :  { %v195_v32 = vadd.f32 %v193_v29, %v190_v21  ;;  %v204_v33 = vmul.f32 %v202_v2, %v201_v27 }
 0x11f   :  { %v167_v5 = vadd.f32 %v165_v59, %v160_v60 }
 0x120   :  { %v206_v42 = vadd.f32 %v204_v33, %v195_v32 }
 0x121   :  { %v178_v9 = vadd.f32 %v176_v0, %v167_v5 }
 0x123   :  { %v189_v16 = vadd.f32 %v187_v8, %v178_v9  ;;  %v197_v17 = vpop.permute.xlu0 %196  ;;  %v265_v8 = vperm.slane %v653_v3, 1  ;;  %v276_v9 = vperm.slane %v653_v3, 2 }
 0x124   :  { %v200_v20 = vsel %vm457_vm5, %v506_v28, %v197_v17  ;;  %v230_v26 = vpop.permute.xlu1 %229  ;;  %v356_v28 = vld [vmem:[%s710_s2 + $0x8] ss:$0 sm:$0xff] }
 0x125   :  { %v194_v23 = vadd.f32 %v192_v10, %v189_v16  ;;  %v203_v24 = vmul.f32 %v202_v2, %v200_v20  ;;  %v233_v14 = vsel %vm457_vm5, %v533_v38, %v230_v26  ;;  %v237_v48 = vmul.f32 %v356_v28, %v234_v45 }
 0x126   :  { %v236_v39 = vmul.f32 %v356_v28, %v233_v14  ;;  %v325_v45 = vperm.slane %v653_v3, 7 }
 0x127   :  { %v205_v30 = vadd.f32 %v203_v24, %v194_v23  ;;  %v292_v24 = vperm.slane %v653_v3, 4 }
 0x129   :  { %v222_v34 = vadd.f32 %v220_v11, %v205_v30 }
 0x12b   :  { %v227_v37 = vadd.f32 %v225_v35, %v222_v34  ;;  %v216_v41 = vpop.permute.xlu0 %215  ;;  %v320_v35 = vperm.slane %v653_v3, 6 }
 0x12c   :  { %v218_v31 = vsel %vm451_vm4, %v546_v40, %v216_v41 }
 0x12d   :  { %v238_v43 = vadd.f32 %v236_v39, %v227_v37  ;;  %v221_v44 = vmul.f32 %v219_v15, %v218_v31 }
 0x12f   :  { %vm240_vm8 = vcmp.ge.f32.partialorder %v238_v43, 0.0  ;;  %v242_v46 = vmul.f32 0.01, %v238_v43  ;;  %v223_v38 = vadd.f32 %v221_v44, %v206_v42 }
 0x131   :  { %v604_v49 = vsel %vm240_vm8, %v238_v43, %v242_v46  ;;  %v228_v50 = vadd.f32 %v226_v47, %v223_v38 }
 0x132   :  { %281 = vrot.lane.b32.xlu1 %v604_v49, %s358_s19  ;;  %v248_v54 = vrot.slane %v604_v49, 7  ;;  %v308_v59 = vrot.slane %v604_v49, 1  ;;  %v293_v33 = vmul.f32 %v292_v24, %v604_v49 }
 0x133   :  { %v239_v51 = vadd.f32 %v237_v48, %v228_v50 }
 0x135   :  { %vm241_vm9 = vcmp.ge.f32.partialorder %v239_v51, 0.0  ;;  %v243_v52 = vmul.f32 0.01, %v239_v51 }
 0x137   :  { %v608_v53 = vsel %vm241_vm9, %v239_v51, %v243_v52 }
 0x138   :  { %283 = vrot.lane.b32.xlu2 %v608_v53, %s358_s19  ;;  %v249_v40 = vrot.slane %v608_v53, 7  ;;  %v309_v58 = vrot.slane %v608_v53, 1  ;;  %v294_v48 = vmul.f32 %v292_v24, %v608_v53 }
 0x13a   :  { %v250_v55 = vsel %vm42_vm1, %v248_v54, %v249_v40  ;;  %v251_v56 = vsel %vm42_vm1, %v249_v40, %v248_v54  ;;  %v631_v60 = vsel %vm107_vm2, %v308_v59, %v309_v58  ;;  %v311_v61 = vsel %vm107_vm2, %v309_v58, %v308_v59 }
 0x13b   :  { %272 = vrot.lane.b32.xlu0 %v250_v55, %s359_s0  ;;  %256 = vrot.lane.b32.xlu1 %v250_v55, %s358_s19  ;;  %v252_v57 = vsel %vm38_vm0, %v604_v49, %v251_v56  ;;  %v644_v62 = vsel %vm104_vm3, %v608_v53, %v311_v61  ;;  %v267_v10 = vmul.f32 %v265_v8, %v250_v55 }
 0x13c   :  { %v266_v20 = vmul.f32 %v265_v8, %v252_v57  ;;  %v327_v3 = vmul.f32 %v325_v45, %v644_v62 }
 0x140   :  { %270 = vrot.lane.b32.xlu2 %v252_v57, %s359_s0 }
 0x143   :  { %254 = vrot.lane.b32.xlu0 %v252_v57, %s358_s19  ;;  %299 = vrot.lane.b32.xlu1 %v608_v53, %s359_s0 }
 0x148   :  { %314 = vrot.lane.b32.xlu2 %v631_v60, %s358_s19 }
 0x14b   :  { %297 = vrot.lane.b32.xlu0 %v604_v49, %s359_s0  ;;  %330 = vrot.lane.b32.xlu1 %v631_v60, %s359_s0 }
 0x150   :  { %332 = vrot.lane.b32.xlu2 %v644_v62, %s359_s0 }
 0x153   :  { %316 = vrot.lane.b32.xlu0 %v644_v62, %s358_s19 }
 0x192   :  { %v284_v0 = vpop.permute.xlu2 %283 }
 0x193   :  { %v286_v29 = vsel %vm451_vm4, %v608_v53, %v284_v0 }
 0x194   :  { %v289_v34 = vmul.f32 %v287_v25, %v286_v29 }
 0x19a   :  { %v271_v7 = vpop.permute.xlu2 %270 }
 0x19b   :  { %v274_v2 = vsel %vm457_vm5, %v252_v57, %v271_v7 }
 0x19c   :  { %v277_v26 = vmul.f32 %v276_v9, %v274_v2 }
 0x1a2   :  { %v315_v30 = vpop.permute.xlu2 %314 }
 0x1a3   :  { %v318_v41 = vsel %vm451_vm4, %v631_v60, %v315_v30 }
 0x1a4   :  { %v282_v63 = vpop.permute.xlu1 %281  ;;  %v321_v38 = vmul.f32 %v320_v35, %v318_v41 }
 0x1a5   :  { %v285_v23 = vsel %vm451_vm4, %v604_v49, %v282_v63 }
 0x1a6   :  { %v288_v14 = vmul.f32 %v287_v25, %v285_v23 }
 0x1aa   :  { %v333_v56 = vpop.permute.xlu2 %332 }
 0x1ad   :  { %v273_v4 = vpop.permute.xlu0 %272  ;;  %v257_v5 = vpop.permute.xlu1 %256 }
 0x1ae   :  { %v259_v12 = vsel %vm451_vm4, %v250_v55, %v257_v5  ;;  %v275_v16 = vsel %vm457_vm5, %v250_v55, %v273_v4  ;;  %v326_v55 = vmul.f32 %v325_v45, %v631_v60  ;;  %v335_v4 = vsel %vm457_vm5, %v644_v62, %v333_v56 }
 0x1af   :  { %v262_v1 = vmul.f32 %v260_v6, %v259_v12  ;;  %v278_v27 = vmul.f32 %v276_v9, %v275_v16 }
 0x1b1   :  { %v269_v18 = vadd.f32 %v267_v10, %v262_v1 }
 0x1b3   :  { %v280_v28 = vadd.f32 %v278_v27, %v269_v18 }
 0x1b5   :  { %v255_v13 = vpop.permute.xlu0 %254  ;;  %v300_v15 = vpop.permute.xlu1 %299  ;;  %v291_v42 = vadd.f32 %v289_v34, %v280_v28 }
 0x1b6   :  { %v258_v17 = vsel %vm451_vm4, %v252_v57, %v255_v13  ;;  %v302_v47 = vsel %vm457_vm5, %v608_v53, %v300_v15 }
 0x1b7   :  { %v261_v21 = vmul.f32 %v260_v6, %v258_v17  ;;  %v296_v52 = vadd.f32 %v294_v48, %v291_v42  ;;  %v305_v54 = vmul.f32 %v303_v36, %v302_v47 }
 0x1b9   :  { %v268_v11 = vadd.f32 %v266_v20, %v261_v21  ;;  %v307_v61 = vadd.f32 %v305_v54, %v296_v52 }
 0x1bb   :  { %v279_v32 = vadd.f32 %v277_v26, %v268_v11 }
 0x1bd   :  { %v290_v37 = vadd.f32 %v288_v14, %v279_v32  ;;  %v298_v39 = vpop.permute.xlu0 %297  ;;  %v331_v46 = vpop.permute.xlu1 %330 }
 0x1be   :  { %v301_v31 = vsel %vm457_vm5, %v604_v49, %v298_v39  ;;  %v334_v51 = vsel %vm457_vm5, %v631_v60, %v331_v46  ;;  %v357_v49 = vld [vmem:[%s711_s3 + $0x8] ss:$0 sm:$0xff] }
 0x1bf   :  { %v295_v43 = vadd.f32 %v293_v33, %v290_v37  ;;  %v304_v44 = vmul.f32 %v303_v36, %v301_v31  ;;  %v337_v58 = vmul.f32 %v357_v49, %v334_v51  ;;  %v338_v6 = vmul.f32 %v357_v49, %v335_v4 }
 0x1c1   :  { %v306_v50 = vadd.f32 %v304_v44, %v295_v43 }
 0x1c3   :  { %v323_v40 = vadd.f32 %v321_v38, %v306_v50 }
 0x1c5   :  { %v328_v57 = vadd.f32 %v326_v55, %v323_v40  ;;  %v317_v59 = vpop.permute.xlu0 %316 }
 0x1c6   :  { %v319_v53 = vsel %vm451_vm4, %v644_v62, %v317_v59 }
 0x1c7   :  { %v339_v63 = vadd.f32 %v337_v58, %v328_v57  ;;  %v322_v0 = vmul.f32 %v320_v35, %v319_v53 }
 0x1c9   :  { %vm341_vm10 = vcmp.ge.f32.partialorder %v339_v63, 0.0  ;;  %v343_v5 = vmul.f32 0.01, %v339_v63  ;;  %v324_v60 = vadd.f32 %v322_v0, %v307_v61 }
 0x1cb   :  { %v345_v12 = vsel %vm341_vm10, %v339_v63, %v343_v5  ;;  %v329_v7 = vadd.f32 %v327_v3, %v324_v60 }
 0x1cc   :  { %347 = vst [vmem:[%s712_s4] sm:$0xff] %v345_v12 }
 0x1cd   :  { %v340_v19 = vadd.f32 %v338_v6, %v329_v7 }
 0x1cf   :  { %vm342_vm11 = vcmp.ge.f32.partialorder %v340_v19, 0.0  ;;  %v344_v8 = vmul.f32 0.01, %v340_v19 }
 0x1d1   :  { %v346_v1 = vsel %vm342_vm11, %v340_v19, %v344_v8 }
 0x1d2   :  { %348 = vst [vmem:[%s712_s4 + $0x8] sm:$0xff] %v346_v1 }

</bundles_post_ra>
